<compile_context>
chip_gen: v6e
topology: v6e:2x2x1
jax: 0.10.0
libtpu: 0.0.40
codegen_flags: <defaults>
</compile_context>

<pallas_src>
import functools

import jax
import jax.numpy as jnp
from jax.experimental import pallas as pl
from jax.experimental.pallas import tpu as pltpu


def _round_up(n, m):
    return ((n + m - 1) // m) * m


def actor_critic_kernel(x_ref, w1_ref, b1_ref, w2_ref, b2_ref, out_ref, *,
                        num_outputs):
    # x: [TB, K_pad] bf16; w1: [K_pad, 2*H_pad] bf16; b1: [1, 2*H_pad] f32.
    x = x_ref[...]

    # ---- layer 1 (critic | actor fused): one bf16 MXU matmul -> f32 acc ----
    h = jnp.dot(x, w1_ref[...], preferred_element_type=jnp.float32) + b1_ref[...]
    h = jnp.maximum(h, 0.0)                           # [TB, 2*H_pad] f32

    # ---- layer 2 (actor head + piggybacked critic column): one matmul ----
    full = jnp.dot(h.astype(jnp.bfloat16), w2_ref[...],
                   preferred_element_type=jnp.float32) + b2_ref[...]
    # full: [TB, n_pad]; lanes <num_outputs = actor logits, lane num_outputs = value.

    col = jax.lax.broadcasted_iota(jnp.int32, full.shape, 1)

    # ---- softmax over actor lanes only (padded lanes masked -> exp == 0) ----
    logits = jnp.where(col < num_outputs, full, jnp.float32(-1e30))
    m = jnp.max(logits, axis=1, keepdims=True)
    e = jnp.exp(logits - m)
    denom = jnp.sum(e, axis=1, keepdims=True)
    # Exact reciprocal (NOT approx=True): probability rows must sum to 1.
    probs = e * (1.0 / denom)

    # ---- lane-dense output: probs | value | zeros ----
    out = jnp.where(col == num_outputs, full, probs)
    out_ref[...] = out.astype(out_ref.dtype)


def prepare_params(params):
    """One-time packing of the four Linear layers into fused, 128-padded,
    bf16 weight slabs.  Call once and reuse for every forward call."""
    num_inputs, hidden = params["w1c"].shape
    num_outputs = params["w2a"].shape[1]

    k_pad = _round_up(num_inputs, 128)         # lane-dense layer-1 K
    h_pad = _round_up(hidden, 128)             # lane-dense h / layer-2 K (per head)
    n_pad = _round_up(num_outputs + 1, 128)    # actor lanes + 1 critic lane
    # NOTE: when num_outputs % 128 == 0 the "+1" critic lane costs an extra
    # 128-lane block of W2/output for a single scalar; a separate small value
    # output would be cheaper in that (niche) case.

    # Layer 1: W1 = [w1c | w1a] in a [k_pad, 2*h_pad] zero-padded slab.
    w1 = jnp.zeros((k_pad, 2 * h_pad), jnp.float32)
    w1 = w1.at[:num_inputs, :hidden].set(params["w1c"])
    w1 = w1.at[:num_inputs, h_pad:h_pad + hidden].set(params["w1a"])
    b1 = jnp.zeros((1, 2 * h_pad), jnp.float32)
    b1 = b1.at[:, :hidden].set(params["b1c"])
    b1 = b1.at[:, h_pad:h_pad + hidden].set(params["b1a"])

    # Layer 2: actor columns fed by the actor half of h, critic value
    # piggybacked in column num_outputs, fed by the critic half of h.
    w2 = jnp.zeros((2 * h_pad, n_pad), jnp.float32)
    w2 = w2.at[:hidden, num_outputs:num_outputs + 1].set(params["w2c"])
    w2 = w2.at[h_pad:h_pad + hidden, :num_outputs].set(params["w2a"])
    b2 = jnp.zeros((1, n_pad), jnp.float32)
    b2 = b2.at[:, :num_outputs].set(params["b2a"])
    b2 = b2.at[:, num_outputs:num_outputs + 1].set(params["b2c"])

    return dict(
        w1=w1.astype(jnp.bfloat16), b1=b1,        # biases stay f32
        w2=w2.astype(jnp.bfloat16), b2=b2,
        num_inputs=num_inputs, num_outputs=num_outputs,
        k_pad=k_pad, h_pad=h_pad, n_pad=n_pad,
    )


def _choose_batch_tile(B):
    """Batch tile: 256-aligned up to 512 rows for large B, and >= 2 grid steps
    when B allows so the 'parallel' axis spans both v7x TensorCores."""
    b8 = _round_up(B, 8)
    if b8 >= 1024:
        return 512
    if b8 >= 512:
        return 256
    if b8 > 16:
        return _round_up((b8 + 1) // 2, 8)      # at least 2 grid steps
    return b8                                    # tiny batch: single step


def actor_critic_forward_packed(x, packed):
    """Run the fused kernel; return the packed [B_pad, n_pad] f32 block
    (lanes [0, num_outputs) = probs, lane num_outputs = value)."""
    B = x.shape[0]
    k_pad, h_pad, n_pad = packed["k_pad"], packed["h_pad"], packed["n_pad"]
    num_inputs = packed["num_inputs"]

    TB = _choose_batch_tile(B)
    B_pad = _round_up(B, TB)
    x = jnp.pad(x, ((0, B_pad - B), (0, k_pad - num_inputs))).astype(jnp.bfloat16)

    w1, b1, w2, b2 = packed["w1"], packed["b1"], packed["w2"], packed["b2"]

    # Scoped-VMEM budget: double-buffered x/out tiles + resident weights/biases
    # (v5e's default scoped limit is only 16 MiB), with some slack.
    vmem_bytes = (2 * (TB * k_pad * 2 + TB * n_pad * 4)
                  + 2 * (w1.size * 2 + w2.size * 2 + b1.size * 4 + b2.size * 4)
                  + (2 << 20))
    vmem_bytes = int(min(max(vmem_bytes, 4 << 20), 64 << 20))

    kernel = functools.partial(actor_critic_kernel,
                               num_outputs=packed["num_outputs"])

    out = pl.pallas_call(
        kernel,
        out_shape=jax.ShapeDtypeStruct((B_pad, n_pad), jnp.float32),
        grid_spec=pltpu.PrefetchScalarGridSpec(
            num_scalar_prefetch=0,
            grid=(B_pad // TB,),
            in_specs=[
                pl.BlockSpec((TB, k_pad), lambda i: (i, 0)),           # x tile
                pl.BlockSpec((k_pad, 2 * h_pad), lambda i: (0, 0)),    # resident W1
                pl.BlockSpec((1, 2 * h_pad), lambda i: (0, 0)),        # resident b1
                pl.BlockSpec((2 * h_pad, n_pad), lambda i: (0, 0)),    # resident W2
                pl.BlockSpec((1, n_pad), lambda i: (0, 0)),            # resident b2
            ],
            out_specs=pl.BlockSpec((TB, n_pad), lambda i: (i, 0)),
        ),
        compiler_params=pltpu.CompilerParams(
            dimension_semantics=("parallel",),
            vmem_limit_bytes=vmem_bytes),
    )(x, w1, b1, w2, b2)
    return out


def actor_critic_forward(x, packed):
    """Convenience wrapper returning (probs, value); consumers that can work
    with the packed layout should call actor_critic_forward_packed to avoid
    the two post-kernel slicing copies."""
    out = actor_critic_forward_packed(x, packed)
    B = x.shape[0]
    no = packed["num_outputs"]
    probs = out[:B, :no]
    value = out[:B, no:no + 1]
    return probs, value


def init_params(key, num_inputs, num_outputs, hidden_size):
    """Deterministic synthetic parameters (PyTorch-like uniform fan-in init)."""
    ks = jax.random.split(key, 8)

    def lin(kw, kb, fan_in, fan_out):
        bound = 1.0 / jnp.sqrt(jnp.float32(fan_in))
        w = jax.random.uniform(kw, (fan_in, fan_out), jnp.float32, -bound, bound)
        b = jax.random.uniform(kb, (1, fan_out), jnp.float32, -bound, bound)
        return w, b

    w1c, b1c = lin(ks[0], ks[1], num_inputs, hidden_size)
    w2c, b2c = lin(ks[2], ks[3], hidden_size, 1)
    w1a, b1a = lin(ks[4], ks[5], num_inputs, hidden_size)
    w2a, b2a = lin(ks[6], ks[7], hidden_size, num_outputs)
    return dict(w1c=w1c, b1c=b1c, w2c=w2c, b2c=b2c,
                w1a=w1a, b1a=b1a, w2a=w2a, b2a=b2a)


def reference_forward(x, p):
    """Pure-JAX f32 reference matching the PyTorch module semantics."""
    h_c = jax.nn.relu(x @ p["w1c"] + p["b1c"])
    value = h_c @ p["w2c"] + p["b2c"]
    h_a = jax.nn.relu(x @ p["w1a"] + p["b1a"])
    logits = h_a @ p["w2a"] + p["b2a"]
    probs = jax.nn.softmax(logits, axis=1)
    return probs, value


if __name__ == "__main__":
    # Small shapes consistent with the module's forward: x is [batch, num_inputs].
    batch, num_inputs, num_outputs, hidden_size = 8, 32, 16, 32

    key = jax.random.PRNGKey(0)
    k_x, k_p = jax.random.split(key)
    x = jax.random.normal(k_x, (batch, num_inputs), dtype=jnp.float32)
    params = init_params(k_p, num_inputs, num_outputs, hidden_size)

    packed = prepare_params(params)            # one-time host-side packing
    probs, value = actor_critic_forward(x, packed)
    probs = jax.block_until_ready(probs)
    value = jax.block_until_ready(value)

    probs_ref, value_ref = reference_forward(x, params)
    assert probs.shape == (batch, num_outputs)
    assert value.shape == (batch, 1)
    # Matmuls use bf16 operands (f32 accumulation) -> relaxed tolerances vs f32 ref.
    assert jnp.allclose(probs, probs_ref, atol=1e-2, rtol=1e-2)
    assert jnp.allclose(value, value_ref, atol=3e-2, rtol=3e-2)
    # Softmax uses an exact reciprocal -> rows sum to 1 up to f32 rounding.
    assert jnp.allclose(jnp.sum(probs, axis=1), jnp.ones((batch,)), atol=1e-5)

    print("KERNEL_OK")
</pallas_src>

<mosaic_0001>
module attributes {stable_mosaic.version = 11 : i64} {
  func.func @actor_critic_kernel(%arg0: i32, %arg1: memref<8x128xbf16, #tpu.memory_space<vmem>>, %arg2: memref<128x256xbf16, #tpu.memory_space<vmem>>, %arg3: memref<1x256xf32, #tpu.memory_space<vmem>>, %arg4: memref<256x128xbf16, #tpu.memory_space<vmem>>, %arg5: memref<1x128xf32, #tpu.memory_space<vmem>>, %arg6: memref<8x128xf32, #tpu.memory_space<vmem>>) attributes {dimension_semantics = [#tpu.dimension_semantics<parallel>], iteration_bounds = array<i64: 1>, scalar_prefetch = 0 : i64, scratch_operands = 0 : i64, tpu.core_type = #tpu.core_type<tc>, window_params = [{transform_indices = @transform_0, window_bounds = array<i64: 8, 128>}, {pipeline_mode = #tpu.pipeline_mode<synchronous>, transform_indices = @transform_1, window_bounds = array<i64: 128, 256>}, {pipeline_mode = #tpu.pipeline_mode<synchronous>, transform_indices = @transform_2, window_bounds = array<i64: 1, 256>}, {pipeline_mode = #tpu.pipeline_mode<synchronous>, transform_indices = @transform_3, window_bounds = array<i64: 256, 128>}, {pipeline_mode = #tpu.pipeline_mode<synchronous>, transform_indices = @transform_4, window_bounds = array<i64: 1, 128>}, {transform_indices = @transform_5, window_bounds = array<i64: 8, 128>}]} {
    %c0 = arith.constant 0 : index
    %c0_0 = arith.constant 0 : index
    %0 = vector.load %arg1[%c0, %c0_0] : memref<8x128xbf16, #tpu.memory_space<vmem>>, vector<8x128xbf16>
    %c0_1 = arith.constant 0 : index
    %c0_2 = arith.constant 0 : index
    %1 = vector.load %arg2[%c0_1, %c0_2] : memref<128x256xbf16, #tpu.memory_space<vmem>>, vector<128x256xbf16>
    %cst = arith.constant dense<0.000000e+00> : vector<8x256xf32>
    %2 = tpu.matmul %0, %1, %cst {dimension_numbers = #tpu.dot_dimension_numbers<[1], [0], [0], [1], [0, 0, 1, 1], [], []>} : vector<8x128xbf16>, vector<128x256xbf16>, vector<8x256xf32> -> vector<8x256xf32>
    %c0_3 = arith.constant 0 : index
    %c0_4 = arith.constant 0 : index
    %3 = vector.load %arg3[%c0_3, %c0_4] : memref<1x256xf32, #tpu.memory_space<vmem>>, vector<1x256xf32>
    %4 = vector.broadcast %3 : vector<1x256xf32> to vector<8x256xf32>
    %5 = arith.addf %2, %4 : vector<8x256xf32>
    %cst_5 = arith.constant 0.000000e+00 : f32
    %6 = vector.broadcast %cst_5 : f32 to vector<8x256xf32>
    %7 = arith.maximumf %5, %6 : vector<8x256xf32>
    %8 = arith.truncf %7 : vector<8x256xf32> to vector<8x256xbf16>
    %c0_6 = arith.constant 0 : index
    %c0_7 = arith.constant 0 : index
    %9 = vector.load %arg4[%c0_6, %c0_7] : memref<256x128xbf16, #tpu.memory_space<vmem>>, vector<256x128xbf16>
    %cst_8 = arith.constant dense<0.000000e+00> : vector<8x128xf32>
    %10 = tpu.matmul %8, %9, %cst_8 {dimension_numbers = #tpu.dot_dimension_numbers<[1], [0], [0], [1], [0, 0, 1, 1], [], []>} : vector<8x256xbf16>, vector<256x128xbf16>, vector<8x128xf32> -> vector<8x128xf32>
    %c0_9 = arith.constant 0 : index
    %c0_10 = arith.constant 0 : index
    %11 = vector.load %arg5[%c0_9, %c0_10] : memref<1x128xf32, #tpu.memory_space<vmem>>, vector<1x128xf32>
    %12 = vector.broadcast %11 : vector<1x128xf32> to vector<8x128xf32>
    %13 = arith.addf %10, %12 : vector<8x128xf32>
    %14 = tpu.iota {dimensions = array<i32: 1>} : vector<8x128xi32>
    %c16_i32 = arith.constant 16 : i32
    %15 = vector.broadcast %c16_i32 : i32 to vector<8x128xi32>
    %16 = arith.cmpi slt, %14, %15 : vector<8x128xi32>
    %cst_11 = arith.constant -1.000000e+30 : f32
    %17 = vector.broadcast %cst_11 : f32 to vector<8x128xf32>
    %18 = arith.select %16, %13, %17 : vector<8x128xi1>, vector<8x128xf32>
    %cst_12 = arith.constant dense<0xFF800000> : vector<8xf32>
    %19 = vector.multi_reduction <maximumf>, %18, %cst_12 [1] : vector<8x128xf32> to vector<8xf32>
    %20 = vector.shape_cast %19 : vector<8xf32> to vector<8x1xf32>
    %21 = vector.broadcast %20 : vector<8x1xf32> to vector<8x128xf32>
    %22 = arith.subf %18, %21 : vector<8x128xf32>
    %23 = math.exp %22 : vector<8x128xf32>
    %cst_13 = arith.constant dense<0.000000e+00> : vector<8xf32>
    %24 = vector.multi_reduction <add>, %23, %cst_13 [1] : vector<8x128xf32> to vector<8xf32>
    %25 = vector.shape_cast %24 : vector<8xf32> to vector<8x1xf32>
    %cst_14 = arith.constant 1.000000e+00 : f32
    %26 = vector.broadcast %cst_14 : f32 to vector<8x1xf32>
    %27 = arith.divf %26, %25 : vector<8x1xf32>
    %28 = vector.broadcast %27 : vector<8x1xf32> to vector<8x128xf32>
    %29 = arith.mulf %23, %28 : vector<8x128xf32>
    %c16_i32_15 = arith.constant 16 : i32
    %30 = vector.broadcast %c16_i32_15 : i32 to vector<8x128xi32>
    %31 = arith.cmpi eq, %14, %30 : vector<8x128xi32>
    %32 = arith.select %31, %13, %29 : vector<8x128xi1>, vector<8x128xf32>
    %c0_16 = arith.constant 0 : index
    %c0_17 = arith.constant 0 : index
    %33 = vector.load %arg6[%c0_16, %c0_17] : memref<8x128xf32, #tpu.memory_space<vmem>>, vector<8x128xf32>
    tpu.vector_store %arg6[%c0_16, %c0_17], %32 {strides = array<i32>} : memref<8x128xf32, #tpu.memory_space<vmem>>, vector<8x128xf32>,
    return
  }
  func.func @transform_0(%arg0: i32) -> (i32, i32) {
    %c0_i32 = arith.constant 0 : i32
    %c0_i32_0 = arith.constant 0 : i32
    return %arg0, %c0_i32 : i32, i32
  }
  func.func @transform_1(%arg0: i32) -> (i32, i32) {
    %c0_i32 = arith.constant 0 : i32
    %c0_i32_0 = arith.constant 0 : i32
    %c0_i32_1 = arith.constant 0 : i32
    return %c0_i32, %c0_i32_0 : i32, i32
  }
  func.func @transform_2(%arg0: i32) -> (i32, i32) {
    %c0_i32 = arith.constant 0 : i32
    %c0_i32_0 = arith.constant 0 : i32
    %c0_i32_1 = arith.constant 0 : i32
    return %c0_i32, %c0_i32_0 : i32, i32
  }
  func.func @transform_3(%arg0: i32) -> (i32, i32) {
    %c0_i32 = arith.constant 0 : i32
    %c0_i32_0 = arith.constant 0 : i32
    %c0_i32_1 = arith.constant 0 : i32
    return %c0_i32, %c0_i32_0 : i32, i32
  }
  func.func @transform_4(%arg0: i32) -> (i32, i32) {
    %c0_i32 = arith.constant 0 : i32
    %c0_i32_0 = arith.constant 0 : i32
    %c0_i32_1 = arith.constant 0 : i32
    return %c0_i32, %c0_i32_0 : i32, i32
  }
  func.func @transform_5(%arg0: i32) -> (i32, i32) {
    %c0_i32 = arith.constant 0 : i32
    %c0_i32_0 = arith.constant 0 : i32
    return %arg0, %c0_i32 : i32, i32
  }
}

</mosaic_0001>

<bundles_post_ra>
// kernel: tpu_custom_call.1
= control target key start
LH: loop header
LB: loop body
LE: loop exit
PB: predicated region body
PF: predicated region fallthrough
CT: control target
= control target key end

     0   :  { %10 = vsyncpa [#allocation3], 0  ;;  %s674_s0 = inlined_call_operand.hbm [shape: bf16[8,128], index: 0, kind: input, shape index: {}]   ;;  %s675_s1 = inlined_call_operand.hbm [shape: bf16[128,256], index: 1, kind: input, shape index: {}]   ;;  %s676_s2 = inlined_call_operand.vmem [shape: f32[1,256], index: 2, kind: input, shape index: {}]   ;;  %s677_s3 = inlined_call_operand.hbm [shape: bf16[256,128], index: 3, kind: input, shape index: {}]   ;;  %s678_s4 = inlined_call_operand.vmem [shape: f32[1,128], index: 4, kind: input, shape index: {}]   ;;  %s679_s5 = inlined_call_operand.hbm [shape: f32[8,128], index: 5, kind: output, shape index: {}]  }
   0x1   :  { %11 = vsyncpa [#allocation6], 0 }
   0x2   :  { %12 = vsyncpa [#allocation4], 0  ;;  %s617_s18 = smov [#allocation5]  }
   0x3   :  { %s28_s19 = sshll.u32 %s617_s18, 4  ;;  %s29_s19 = int_to_ptr.vmem [resolvable:$true] %s28_s19 }
   0x4   :  { %s539_s20 = scalar_lea.vmem %s29_s19, 2048  ;;  %p544_p1 = scmp.lt.s32.totalorder %s29_s19, %s29_s19 }
   0x5   :  { %p540_p0 = scmp.ne.s32.totalorder %s29_s19, %s539_s20  ;;  %p545_p2 = scmp.lt.s32.totalorder %s539_s20, %s539_s20 }
   0x7   :  { %p546_p3 = por %p545_p2, %p544_p1 }
   0x9   :  { %p547_p4 = pnand %p546_p3, %p540_p0 }
   0xb   :  { %550 = shalt.err (!%p547_p4)
}
   0xc   :  { %s618_s21 = smov 128   ;;  %s619_s22 = smov 8  }
   0xd   :  { %34 = dma.hbm_to_vmem [thread:$0]  %s675_s1, 2048, %s29_s19, [#allocation6], %s618_s21, %s618_s21, %s619_s22  }
   0xe   :  { %s620_s25 = smov [#allocation2]   ;;  %s621_s27 = smov [#allocation7]  }
   0xf   :  { %s19_s26 = sshll.u32 %s620_s25, 4  ;;  %s42_s28 = sshll.u32 %s621_s27, 4  ;;  %s20_s26 = int_to_ptr.vmem [resolvable:$true] %s19_s26  ;;  %s43_s28 = int_to_ptr.vmem [resolvable:$true] %s42_s28 }
  0x10   :  { %s559_s29 = scalar_lea.vmem %s20_s26, 64  ;;  %p564_p6 = scmp.lt.s32.totalorder %s20_s26, %s20_s26 }
  0x11   :  { %p560_p5 = scmp.ne.s32.totalorder %s20_s26, %s559_s29  ;;  %p565_p7 = scmp.lt.s32.totalorder %s559_s29, %s559_s29 }
  0x13   :  { %p566_p8 = por %p565_p7, %p564_p6 }
  0x15   :  { %p567_p9 = pnand %p566_p8, %p560_p5 }
  0x17   :  { %570 = shalt.err (!%p567_p9)
}
  0x18   :  { %22 = dma.hbm_to_vmem [thread:$0]  %s674_s0, 64, %s20_s26, [#allocation3]  }
  0x19   :  { %s579_s7 = scalar_lea.vmem %s43_s28, 2048  ;;  %p584_p11 = scmp.lt.s32.totalorder %s43_s28, %s43_s28 }
  0x1a   :  { %p580_p10 = scmp.ne.s32.totalorder %s43_s28, %s579_s7  ;;  %p585_p12 = scmp.lt.s32.totalorder %s579_s7, %s579_s7 }
  0x1c   :  { %p586_p13 = por %p585_p12, %p584_p11 }
  0x1e   :  { %p587_p0 = pnand %p586_p13, %p580_p10 }
  0x20   :  { %590 = shalt.err (!%p587_p0)
}
  0x21   :  { %s622_s1 = smov 64   ;;  %s623_s8 = smov 4  }
  0x22   :  { %48 = dma.hbm_to_vmem [thread:$0]  %s677_s3, 2048, %s43_s28, [#allocation6], %s622_s1, %s622_s1, %s623_s8  }
  0x23   :  { %611 = dma.done.wait [#allocation3], 64  }
  0x24   :  { %612 = vsyncadd [#allocation3], 4294967232 }
  0x25   :  { %613 = dma.done.wait [#allocation6], 4096  }
  0x26   :  { %614 = vsyncadd [#allocation6], 4294963200  ;;  %v624_v0 = vmov 0   ;;  %v487_v1 = vld [vmem:[#allocation5 + $0x74] ss:$8 sps:$4 sm:$0xff]   ;;  %v515_v15 = vld [vmem:[#allocation7 + $0x68] sm:$0xff]   ;;  %v80_v34 = vlaneseq }
  0x27   :  { %202 = vmatprep.mubr.bf16.mxu0 %v624_v0  ;;  %v489_v2 = vld [vmem:[#allocation5 + $0x70] ss:$8 sps:$4 sm:$0xff]   ;;  %170 = vmatprep.subr.bf16.mxu0 %v487_v1  ;;  %v490_v3 = vld [vmem:[#allocation5 + $0x64] ss:$8 sps:$4 sm:$0xff]   ;;  %v492_v4 = vld [vmem:[#allocation5 + $0x60] ss:$8 sps:$4 sm:$0xff]  }
  0x28   :  { %171 = vmatpush1.bf16.msra.mxu0 %v489_v2  ;;  %v493_v5 = vld [vmem:[#allocation5 + $0x54] ss:$8 sps:$4 sm:$0xff]   ;;  %v495_v6 = vld [vmem:[#allocation5 + $0x50] ss:$8 sps:$4 sm:$0xff]   ;;  %v496_v7 = vld [vmem:[#allocation5 + $0x44] ss:$8 sps:$4 sm:$0xff]  }
  0x29   :  { %172 = vmatprep.subr.bf16.mxu0 %v490_v3  ;;  %v498_v8 = vld [vmem:[#allocation5 + $0x40] ss:$8 sps:$4 sm:$0xff]   ;;  %v499_v9 = vld [vmem:[#allocation5 + $0x34] ss:$8 sps:$4 sm:$0xff]   ;;  %v501_v12 = vld [vmem:[#allocation5 + $0x30] ss:$8 sps:$4 sm:$0xff]  }
  0x2a   :  { %v511_v10 = vld [vmem:[#allocation7 + $0x78] sm:$0xff]   ;;  %v513_v13 = vld [vmem:[#allocation7 + $0x70] sm:$0xff]   ;;  %v502_v16 = vld [vmem:[#allocation5 + $0x24] ss:$8 sps:$4 sm:$0xff]   ;;  %v81_v35 = vshrl.u32 %v80_v34, 7  ;;  %v391_v52 = vand.u32 127, %v80_v34 }
  0x2b   :  { %v512_v11 = vld [vmem:[#allocation7 + $0x38] sm:$0xff]   ;;  %456 = vmatprep.subr.bf16.mxu1 %v511_v10  ;;  %v514_v14 = vld [vmem:[#allocation7 + $0x30] sm:$0xff]   ;;  %v504_v17 = vld [vmem:[#allocation5 + $0x20] ss:$8 sps:$4 sm:$0xff]   ;;  %s625_s12 = smov [#allocation8]  }
  0x2c   :  { %173 = vmatpush1.bf16.msra.mxu0 %v492_v4  ;;  %457 = vmatpush3.bf16.msra.mxu1 %v512_v11  ;;  %v516_v18 = vld [vmem:[#allocation7 + $0x28] sm:$0xff]   ;;  %v517_v19 = vld [vmem:[#allocation7 + $0x60] sm:$0xff]   ;;  %v505_v20 = vld [vmem:[#allocation5 + $0x14] ss:$8 sps:$4 sm:$0xff]   ;;  %v82_v36 = vsub.s32 0, %v81_v35  ;;  %v86_v38 = vsub.s32 1, %v81_v35 }
  0x2d   :  { %174 = vmatprep.subr.bf16.mxu0 %v493_v5  ;;  %458 = vmatprep.subr.bf16.mxu1 %v513_v13  ;;  %v507_v21 = vld [vmem:[#allocation5 + $0x10] ss:$8 sps:$4 sm:$0xff]   ;;  %v508_v22 = vld [vmem:[#allocation5 + $0x4] ss:$8 sps:$4 sm:$0xff]   ;;  %v510_v26 = vld [vmem:[#allocation5] ss:$8 sps:$4 sm:$0xff]  }
  0x2e   :  { %v518_v23 = vld [vmem:[#allocation7 + $0x20] sm:$0xff]   ;;  %v519_v24 = vld [vmem:[#allocation7 + $0x58] sm:$0xff]   ;;  %v521_v27 = vld [vmem:[#allocation7 + $0x50] sm:$0xff]   ;;  %vm392_vm0 = vcmp.lt.s32.totalorder %v391_v52, 16  ;;  %s413_s13 = sshll.u32 %s625_s12, 4  ;;  %vm404_vm1 = vcmp.eq.s32.totalorder %v391_v52, 16  ;;  %s414_s13 = int_to_ptr.vmem [resolvable:$true] %s413_s13 }
  0x2f   :  { %v520_v25 = vld [vmem:[#allocation7 + $0x18] sm:$0xff]   ;;  %v522_v28 = vld [vmem:[#allocation7 + $0x10] sm:$0xff]   ;;  %v523_v30 = vld [vmem:[#allocation7 + $0x48] sm:$0xff]   ;;  %p596_p2 = scmp.lt.s32.totalorder %s414_s13, %s414_s13 }
  0x30   :  { %175 = vmatpush1.bf16.msra.mxu0 %v495_v6  ;;  %459 = vmatpush3.bf16.msra.mxu1 %v514_v14  ;;  %v61_v29 = vld [vmem:[#allocation2] sm:$0xf]  ;;  %v524_v31 = vld [vmem:[#allocation7 + $0x8] sm:$0xff]   ;;  %v525_v32 = vld [vmem:[#allocation7 + $0x40] sm:$0xff]  }
  0x31   :  { %176 = vmatprep.subr.bf16.mxu0 %v496_v7  ;;  %460 = vmatprep.subr.bf16.mxu1 %v515_v15  ;;  %v526_v33 = vld [vmem:[#allocation7] sm:$0xff]   ;;  %v78_v37 = vld [vmem:[%s676_s2] sm:$0x3] }
  0x32   :  { %v83_v39 = vrot.slane %v78_v37, %v82_v36  ;;  %v87_v40 = vrot.slane %v78_v37, %v86_v38  ;;  %v439_v54 = vld [vmem:[%s678_s4] ss:$0 sm:$0xff]  ;;  %s591_s4 = scalar_lea.vmem %s414_s13, 128 }
  0x33   :  { %p592_p1 = scmp.ne.s32.totalorder %s414_s13, %s591_s4  ;;  %p597_p3 = scmp.lt.s32.totalorder %s591_s4, %s591_s4 }
  0x34   :  { %177 = vmatpush1.bf16.msra.mxu0 %v498_v8  ;;  %461 = vmatpush3.bf16.msra.mxu1 %v516_v18 }
  0x35   :  { %178 = vmatprep.subr.bf16.mxu0 %v499_v9  ;;  %462 = vmatprep.subr.bf16.mxu1 %v517_v19  ;;  %p598_p4 = por %p597_p3, %p596_p2 }
  0x37   :  { %p599_p5 = pnand %p598_p4, %p592_p1 }
  0x38   :  { %179 = vmatpush1.bf16.msra.mxu0 %v501_v12  ;;  %463 = vmatpush3.bf16.msra.mxu1 %v518_v23 }
  0x39   :  { %180 = vmatprep.subr.bf16.mxu0 %v502_v16  ;;  %464 = vmatprep.subr.bf16.mxu1 %v519_v24 }
  0x3c   :  { %181 = vmatpush1.bf16.msra.mxu0 %v504_v17  ;;  %465 = vmatpush3.bf16.msra.mxu1 %v520_v25 }
  0x3d   :  { %182 = vmatprep.subr.bf16.mxu0 %v505_v20  ;;  %466 = vmatprep.subr.bf16.mxu1 %v521_v27 }
  0x40   :  { %183 = vmatpush1.bf16.msra.mxu0 %v507_v21  ;;  %467 = vmatpush3.bf16.msra.mxu1 %v522_v28 }
  0x41   :  { %184 = vmatprep.subr.bf16.mxu0 %v508_v22  ;;  %468 = vmatprep.subr.bf16.mxu1 %v523_v30 }
  0x44   :  { %185 = vmatpush1.bf16.msra.mxu0 %v510_v26  ;;  %469 = vmatpush3.bf16.msra.mxu1 %v524_v31 }
  0x45   :  { %470 = vmatprep.subr.bf16.mxu1 %v525_v32 }
  0x47   :  { %203 = vmatmul.mubr.bf16.vlgmr.msra.gmra.mxu0 %v61_v29 }
  0x48   :  { %471 = vmatpush3.bf16.msra.mxu1 %v526_v33 }
 0x107   :  { %v204_v41 = vpop.f32.mrf.mxu0 }
 0x108   :  { %v205_v42 = vadd.f32 %v204_v41, %v83_v39 }
 0x109   :  { %v206_v43 = vpop.f32.mrf.mxu0 }
 0x10a   :  { %v207_v44 = vadd.f32 %v206_v43, %v87_v40  ;;  %v211_v45 = vmax.f32 %v205_v42, 0.0 }
 0x10b   :  { %v208_v46 = vpop.f32.mrf.mxu0 }
 0x10c   :  { %v212_v47 = vmax.f32 %v207_v44, 0.0  ;;  %v213_v50 = vpack.c.bf16 %v211_v45, %v211_v45 }
 0x10d   :  { %v209_v48 = vpop.f32.mrf.mxu0 }
 0x10e   :  { %v214_v49 = vpack.c.bf16 %v212_v47, %v212_v47 }
 0x110   :  { %382 = vmatprep.mubr.bf16.mxu1 %v214_v49 }
 0x111   :  { %383 = vmatmul.mubr.bf16.vlgmr.msra.gmra.mxu1 %v213_v50 }
 0x1d1   :  { %v472_v51 = vpop.f32.mrf.mxu1 }
 0x1d3   :  { %v473_v53 = vpop.f32.mrf.mxu1 }
 0x1d4   :  { %v474_v55 = vadd.f32 %v473_v53, %v472_v51 }
 0x1d5   :  { %v475_v56 = vpop.f32.mrf.mxu1 }
 0x1d6   :  { %v385_v57 = vadd.f32 %v474_v55, %v439_v54 }
 0x1d7   :  { %v476_v58 = vpop.f32.mrf.mxu1 }
 0x1d8   :  { %v393_v59 = vsel %vm392_vm0, %v385_v57, -1e+30 }
 0x1d9   :  { %394 = vmax.xlane.f32.xlu0 %v393_v59 }
 0x262   :  { %v395_v60 = vpop.xlane.xlu0 %394 }
 0x263   :  { %v396_v61 = vsub.f32 %v393_v59, %v395_v60 }
 0x265   :  { %v397_v62 = vmul.f32 1.442695, %v396_v61 }
 0x267   :  { %527 = vpow2.f32 %v397_v62 }
 0x274   :  { %v528_v63 = vpop.eup %527 }
 0x275   :  { %399 = vadd.xlane.f32.xlu0 %v528_v63 }
 0x2fe   :  { %v400_v0 = vpop.xlane.xlu0 %399 }
 0x2ff   :  { %529 = vrcp.f32 %v400_v0 }
 0x30c   :  { %v530_v1 = vpop.eup %529 }
 0x30d   :  { %v403_v2 = vmul.f32 %v530_v1, %v528_v63 }
 0x30f   :  { %v405_v3 = vsel %vm404_vm1, %v385_v57, %v403_v2 }
 0x310   :  { %406 = vst [vmem:[#allocation8] sm:$0xff] %v405_v3 }
 0x311   :  { %602 = shalt.err (!%p599_p5)
}
 0x312   :  { %416 = dma.vmem_to_hbm [thread:$0]  %s414_s13, 128, %s679_s5, [#allocation4]  }
 0x313   :  { %615 = dma.done.wait [#allocation4], 128  }
 0x314   :  { %616 = vsyncadd [#allocation4], 4294967168 }
 0x315   :  { %420 = vsyncpa [#allocation3], 1 }
 0x316   :  { %421 = vsyncpa [#allocation6], 1 }
 0x317   :  { %422 = vsyncpa [#allocation4], 1 }

</bundles_post_ra>
